<compile_context>
chip_gen: v5e
topology: v5e:2x2
jax: 0.10.0
libtpu: 0.0.40
codegen_flags: <defaults>
</compile_context>

<pallas_src>
import jax
import jax.numpy as jnp
import numpy as np
from jax.experimental import pallas as pl
from jax.experimental.pallas import tpu as pltpu

N_CAND = 50  # 1 positive + 49 negatives, as in the PyTorch forward


# ----------------------------------------------------------------------------
# Pallas kernel: temporal rotation + fused L1 scoring + reg partial sums
# ----------------------------------------------------------------------------
def tero_kernel(eh_r_ref, eh_i_ref, et_r_ref, et_i_ref, rr_ref, ri_ref,
                dre_ref, dim_ref,
                out_ref, reg_hr_ref, reg_tr_ref, reg_hi_ref, reg_ti_ref):
    dre = dre_ref[...]          # cos(time emb)  (TB, 1, D)
    dim_ = dim_ref[...]         # sin(time emb)  (TB, 1, D)

    eh_r = eh_r_ref[...]        # head real      (TB, Ch, D)
    eh_i = eh_i_ref[...]        # head img       (TB, Ch, D)
    et_r = et_r_ref[...]        # tail real      (TB, Ct, D)
    et_i = et_i_ref[...]        # tail img       (TB, Ct, D)

    # temporal rotation (broadcast over the candidate axis)
    h_real = eh_r * dre - eh_i * dim_
    h_img = eh_r * dim_ + eh_i * dre
    t_real = et_r * dre - et_i * dim_
    t_img = et_r * dim_ + et_i * dre

    rr = rr_ref[...]            # relation real  (TB, 1, D)
    ri = ri_ref[...]            # relation img   (TB, 1, D)

    # Fused L1 scoring (self.L == 'L1'): one lane (XLU) reduction over D.
    out_ref[...] = jnp.sum(
        jnp.abs(h_real + rr - t_real) + jnp.abs(h_img + ri + t_img), axis=-1)

    # Regularizer contribution: per-example L1 partial sums of the rotated
    # tensors (no [B, 50, D] HBM writeback).
    def l1(x):                                       # (TB, Cx, D) -> (TB, 1)
        return jnp.sum(jnp.abs(x), axis=2).sum(axis=1, keepdims=True)

    reg_hr_ref[...] = l1(h_real)
    reg_tr_ref[...] = l1(t_real)
    reg_hi_ref[...] = l1(h_img)
    reg_ti_ref[...] = l1(t_img)


# ----------------------------------------------------------------------------
# Generation-aware batch-block sizing
# ----------------------------------------------------------------------------
def _choose_block_b(B, D, Ch, Ct):
    """Pick the batch tile (TB) and a vmem_limit from the chip's VMEM size."""
    try:
        vmem_cap = int(pltpu.get_tpu_info().vmem_capacity_bytes)
    except Exception:
        vmem_cap = 128 * 1024 * 1024          # v5e/v6e default

    if vmem_cap >= 128 * 1024 * 1024:         # v5e / v6e: 128 MiB physical
        block_budget = 48 * 1024 * 1024       # single-copy block budget
        vmem_limit = 100 * 1024 * 1024
    else:                                     # v7x: 64 MiB physical per TC
        block_budget = 16 * 1024 * 1024
        vmem_limit = 32 * 1024 * 1024

    def pad8(c):                              # VMEM sublane padding of the C axis
        return max(8, ((c + 7) // 8) * 8)

    # f32 bytes of all blocks for ONE example (inputs + tiny outputs).
    per_ex = 4 * D * (2 * pad8(Ch) + 2 * pad8(Ct) + 4 * 8) + 4 * (max(Ch, Ct) + 4)

    tb = max(1, block_budget // (2 * per_ex))  # x2: double-buffered pipelining
    if tb >= B:
        if B <= 8:
            return B, vmem_limit
        # keep >= 2 grid steps so both v7x TensorCores get work
        tb = max(8, ((B // 2) // 8) * 8)
        return min(tb, B), vmem_limit
    return max(8, (tb // 8) * 8), vmem_limit


# ----------------------------------------------------------------------------
# pallas_call wrapper
# ----------------------------------------------------------------------------
def tero_score_pallas(eh_r, eh_i, et_r, et_i, rr, ri, dre, dim_, *, block_b=None):
    B, Ch, D = eh_r.shape
    Ct = et_r.shape[1]
    C = max(Ch, Ct)               # candidate count (one of Ch/Ct is 1)

    if block_b is None:
        TB, vmem_limit = _choose_block_b(B, D, Ch, Ct)
    else:
        TB, vmem_limit = block_b, 100 * 1024 * 1024
    grid = (pl.cdiv(B, TB),)

    def spec3(c):
        return pl.BlockSpec((TB, c, D), lambda b: (b, 0, 0))

    in_specs = [
        spec3(Ch), spec3(Ch),     # eh_r, eh_i
        spec3(Ct), spec3(Ct),     # et_r, et_i
        spec3(1), spec3(1),       # rr, ri
        spec3(1), spec3(1),       # dre (cos), dim (sin)
    ]
    score_spec = pl.BlockSpec((TB, C), lambda b: (b, 0))
    reg_spec = pl.BlockSpec((TB, 1), lambda b: (b, 0))
    out_specs = (score_spec, reg_spec, reg_spec, reg_spec, reg_spec)
    out_shapes = (
        jax.ShapeDtypeStruct((B, C), jnp.float32),      # scores
        jax.ShapeDtypeStruct((B, 1), jnp.float32),      # sum |h_real|
        jax.ShapeDtypeStruct((B, 1), jnp.float32),      # sum |t_real|
        jax.ShapeDtypeStruct((B, 1), jnp.float32),      # sum |h_img|
        jax.ShapeDtypeStruct((B, 1), jnp.float32),      # sum |t_img|
    )

    bytes_in = 4 * B * D * (2 * Ch + 2 * Ct + 4)
    bytes_out = 4 * B * (C + 4)
    cost = pl.CostEstimate(flops=int(15 * B * C * D + 12 * B * D),
                           transcendentals=0,
                           bytes_accessed=int(bytes_in + bytes_out))

    return pl.pallas_call(
        tero_kernel,
        out_shape=out_shapes,
        grid=grid,
        in_specs=in_specs,
        out_specs=out_specs,
        compiler_params=pltpu.CompilerParams(
            dimension_semantics=("parallel",),
            vmem_limit_bytes=int(vmem_limit)),
        cost_estimate=cost,
    )(eh_r, eh_i, et_r, et_i, rr, ri, dre, dim_)


# ----------------------------------------------------------------------------
# Parameter init (mirrors the PyTorch __init__ uniform(-r, r))
# ----------------------------------------------------------------------------
def init_params(key, sizes, rank):
    n_entity, n_relation, _, n_time = sizes
    r = 6.0 / np.sqrt(rank)
    keys = jax.random.split(key, 5)
    uni = lambda k, shape: jax.random.uniform(
        k, shape, minval=-r, maxval=r, dtype=jnp.float32)
    return {
        "emb_E_real": uni(keys[0], (n_entity, rank)),
        "emb_E_img": uni(keys[1], (n_entity, rank)),
        "emb_R_real": uni(keys[2], (n_relation * 2, rank)),
        "emb_R_img": uni(keys[3], (n_relation * 2, rank)),
        "emb_Time": uni(keys[4], (n_time, rank)),
    }


# ----------------------------------------------------------------------------
# Forward wrapper (index building + gathers = glue; math = Pallas kernel)
# ----------------------------------------------------------------------------
def tero_forward(params, x, neg_key, type_="o", reg_mode="reduced"):
    """x: int32 [B, 4] = (head, rel, tail, time).  Returns (out[B,50], reg, None).

    reg_mode="reduced" (default, fast): rotated-tensor reg pieces are returned
    as per-example L1 partial sums [B, 1] from the kernel; the relation/time
    pieces are [B, D].  reg_mode="full": exact PyTorch shapes ([B*50, D]
    everywhere), recomputed in plain JAX (opt-in; reintroduces HBM traffic).
    """
    B = x.shape[0]
    n_entity, D = params["emb_E_real"].shape

    # TODO(synk): PyTorch uses Python random.choices for negative sampling; here a
    # deterministic jax.random draw with the same semantics (uniform entity ids).
    neg = jax.random.randint(neg_key, (B, N_CAND - 1), 0, n_entity, dtype=jnp.int32)

    if type_ == "o":
        h_idx = x[:, 0]                                        # fixed (dedup'd)
        t_idx = jnp.concatenate([x[:, 2:3], neg], axis=-1)     # [B, 50] candidates
    elif type_ == "s":
        t_idx = x[:, 2]
        h_idx = jnp.concatenate([x[:, 0:1], neg], axis=-1)
    else:
        raise ValueError("type_ must be 'o' or 's'")
    r_idx = x[:, 1]
    d_idx = x[:, 3] % 3          # '% 3' mirrors the original PyTorch forward

    # Precompute sin/cos on the tiny [n_time, D] table (no in-kernel EUP work).
    sin_t = jnp.sin(params["emb_Time"])
    cos_t = jnp.cos(params["emb_Time"])

    def gather(tab, idx):
        e = tab[idx]
        return e[:, None, :] if e.ndim == 2 else e   # [B,D] -> [B,1,D]

    # TODO(synk): the candidate-side [B,50,D] gathers still take an XLA-gather
    # HBM round-trip; fusing them into the kernel needs a manual per-row DMA
    # gather (scalar-prefetched indices + memory_space=pl.ANY), whose ~100
    # small-row DMAs per example were judged too risky/slow to adopt here.
    eh_r = gather(params["emb_E_real"], h_idx)
    eh_i = gather(params["emb_E_img"], h_idx)
    et_r = gather(params["emb_E_real"], t_idx)
    et_i = gather(params["emb_E_img"], t_idx)
    rr = gather(params["emb_R_real"], r_idx)
    ri = gather(params["emb_R_img"], r_idx)
    dre = gather(cos_t, d_idx)
    dim_ = gather(sin_t, d_idx)

    out, reg_hr, reg_tr, reg_hi, reg_ti = tero_score_pallas(
        eh_r, eh_i, et_r, et_i, rr, ri, dre, dim_)

    if reg_mode == "reduced":
        reg = (reg_hr,                 # sum |h_real| per example   [B, 1]
               reg_tr,                 # sum |t_real| per example   [B, 1]
               rr[:, 0, :],            # r_real                     [B, D]
               reg_hi,                 # sum |h_img| per example    [B, 1]
               reg_ti,                 # sum |t_img| per example    [B, 1]
               ri[:, 0, :],            # r_img                      [B, D]
               dim_[:, 0, :],          # d_img                      [B, D]
               dre[:, 0, :])           # d_real                     [B, D]
    elif reg_mode == "full":
        def bcast(a):
            if a.shape[1] == 1:
                a = jnp.broadcast_to(a, (B, N_CAND, D))
            return a.reshape(B * N_CAND, D)
        h_real = bcast(eh_r * dre - eh_i * dim_)
        t_real = bcast(et_r * dre - et_i * dim_)
        h_img = bcast(eh_r * dim_ + eh_i * dre)
        t_img = bcast(et_r * dim_ + et_i * dre)
        reg = (h_real, t_real, bcast(rr), h_img, t_img, bcast(ri),
               bcast(dim_), bcast(dre))
    else:
        raise ValueError("reg_mode must be 'reduced' or 'full'")

    return out.reshape(-1, N_CAND), reg, None


# ----------------------------------------------------------------------------
# Pure-JAX reference of the original (un-deduplicated) forward math
# ----------------------------------------------------------------------------
def tero_ref_forward(params, x, neg, type_="o"):
    if type_ == "o":
        h_i = jnp.repeat(x[:, 0:1], N_CAND, axis=1)
        r_i = jnp.repeat(x[:, 1:2], N_CAND, axis=1)
        t_i = jnp.concatenate([x[:, 2:3], neg], axis=-1)
    else:
        t_i = jnp.repeat(x[:, 2:3], N_CAND, axis=1)
        r_i = jnp.repeat(x[:, 1:2], N_CAND, axis=1)
        h_i = jnp.concatenate([x[:, 0:1], neg], axis=-1)
    d_i = jnp.repeat(x[:, 3:4], N_CAND, axis=1) % 3
    h_i, r_i, t_i, d_i = (a.reshape(-1) for a in (h_i, r_i, t_i, d_i))

    td = params["emb_Time"][d_i]
    d_img = jnp.sin(td)
    d_real = jnp.cos(td)
    eh_r = params["emb_E_real"][h_i]
    eh_i = params["emb_E_img"][h_i]
    et_r = params["emb_E_real"][t_i]
    et_i = params["emb_E_img"][t_i]
    h_real = eh_r * d_real - eh_i * d_img
    t_real = et_r * d_real - et_i * d_img
    h_img = eh_r * d_img + eh_i * d_real
    t_img = et_r * d_img + et_i * d_real
    rr = params["emb_R_real"][r_i]
    ri = params["emb_R_img"][r_i]
    out_real = jnp.sum(jnp.abs(h_real + rr - t_real), axis=1)
    out_img = jnp.sum(jnp.abs(h_img + ri + t_img), axis=1)
    out = (out_real + out_img).reshape(-1, N_CAND)
    reg = (h_real, t_real, rr, h_img, t_img, ri, d_img, d_real)
    return out, reg


if __name__ == "__main__":
    # small synthetic config: sizes = (n_entity, n_relation, n_entity, n_time)
    sizes = (20, 5, 20, 7)
    rank = 32          # embedding_dim (real model uses 500; lanes scale up fine)
    B = 2

    key = jax.random.PRNGKey(0)
    k_param, k_x, k_neg = jax.random.split(key, 3)

    params = init_params(k_param, sizes, rank)

    heads = jax.random.randint(k_x, (B, 1), 0, sizes[0], dtype=jnp.int32)
    rels = jax.random.randint(jax.random.fold_in(k_x, 1), (B, 1), 0,
                              sizes[1] * 2, dtype=jnp.int32)
    tails = jax.random.randint(jax.random.fold_in(k_x, 2), (B, 1), 0,
                               sizes[0], dtype=jnp.int32)
    times = jax.random.randint(jax.random.fold_in(k_x, 3), (B, 1), 0,
                               sizes[3], dtype=jnp.int32)
    x = jnp.concatenate([heads, rels, tails, times], axis=1)

    neg = jax.random.randint(k_neg, (B, N_CAND - 1), 0, sizes[0], dtype=jnp.int32)

    # verify both replacement modes against the reference math (full reg shapes)
    for type_ in ("o", "s"):
        out, reg, _ = tero_forward(params, x, k_neg, type_=type_, reg_mode="full")
        out = jax.block_until_ready(out)
        ref_out, ref_reg = tero_ref_forward(params, x, neg, type_=type_)
        assert out.shape == (B, N_CAND), out.shape
        np.testing.assert_allclose(np.asarray(out), np.asarray(ref_out),
                                   rtol=1e-5, atol=1e-5)
        assert len(reg) == 8
        for got, want in zip(reg, ref_reg):
            assert got.shape == (B * N_CAND, rank), got.shape
            np.testing.assert_allclose(np.asarray(got), np.asarray(want),
                                       rtol=1e-5, atol=1e-5)

    # default fast path: reduced reg (no [B,50,D] writeback from the kernel)
    out_d, reg_d, _ = tero_forward(params, x, k_neg, type_="o", reg_mode="reduced")
    out_d = jax.block_until_ready(out_d)
    assert out_d.shape == (B, N_CAND)
    ref_out, ref_reg = tero_ref_forward(params, x, neg, type_="o")
    np.testing.assert_allclose(np.asarray(out_d), np.asarray(ref_out),
                               rtol=1e-5, atol=1e-5)
    exp_shapes = [(B, 1), (B, 1), (B, rank), (B, 1), (B, 1),
                  (B, rank), (B, rank), (B, rank)]
    assert [tuple(a.shape) for a in reg_d] == exp_shapes, \
        [tuple(a.shape) for a in reg_d]

    # validate the in-kernel L1 partial sums of the rotated tensors
    ref_h_real = np.abs(np.asarray(ref_reg[0])).reshape(B, N_CAND, rank)
    ref_t_real = np.abs(np.asarray(ref_reg[1])).reshape(B, N_CAND, rank)
    ref_h_img = np.abs(np.asarray(ref_reg[3])).reshape(B, N_CAND, rank)
    ref_t_img = np.abs(np.asarray(ref_reg[4])).reshape(B, N_CAND, rank)
    np.testing.assert_allclose(np.asarray(reg_d[0][:, 0]),
                               ref_h_real[:, 0, :].sum(-1), rtol=1e-4, atol=1e-4)
    np.testing.assert_allclose(np.asarray(reg_d[1][:, 0]),
                               ref_t_real.sum((-1, -2)), rtol=1e-4, atol=1e-4)
    np.testing.assert_allclose(np.asarray(reg_d[3][:, 0]),
                               ref_h_img[:, 0, :].sum(-1), rtol=1e-4, atol=1e-4)
    np.testing.assert_allclose(np.asarray(reg_d[4][:, 0]),
                               ref_t_img.sum((-1, -2)), rtol=1e-4, atol=1e-4)

    print("KERNEL_OK")
</pallas_src>

<mosaic_0001>
module attributes {stable_mosaic.version = 11 : i64} {
  func.func @tero_kernel(%arg0: i32, %arg1: memref<2x1x32xf32, #tpu.memory_space<vmem>>, %arg2: memref<2x1x32xf32, #tpu.memory_space<vmem>>, %arg3: memref<2x50x32xf32, #tpu.memory_space<vmem>>, %arg4: memref<2x50x32xf32, #tpu.memory_space<vmem>>, %arg5: memref<2x1x32xf32, #tpu.memory_space<vmem>>, %arg6: memref<2x1x32xf32, #tpu.memory_space<vmem>>, %arg7: memref<2x1x32xf32, #tpu.memory_space<vmem>>, %arg8: memref<2x1x32xf32, #tpu.memory_space<vmem>>, %arg9: memref<2x50xf32, #tpu.memory_space<vmem>>, %arg10: memref<2x1xf32, #tpu.memory_space<vmem>>, %arg11: memref<2x1xf32, #tpu.memory_space<vmem>>, %arg12: memref<2x1xf32, #tpu.memory_space<vmem>>, %arg13: memref<2x1xf32, #tpu.memory_space<vmem>>) attributes {dimension_semantics = [#tpu.dimension_semantics<parallel>], iteration_bounds = array<i64: 1>, scalar_prefetch = 0 : i64, scratch_operands = 0 : i64, tpu.core_type = #tpu.core_type<tc>, window_params = [{transform_indices = @transform_0, window_bounds = array<i64: 2, 1, 32>}, {transform_indices = @transform_1, window_bounds = array<i64: 2, 1, 32>}, {transform_indices = @transform_2, window_bounds = array<i64: 2, 50, 32>}, {transform_indices = @transform_3, window_bounds = array<i64: 2, 50, 32>}, {transform_indices = @transform_4, window_bounds = array<i64: 2, 1, 32>}, {transform_indices = @transform_5, window_bounds = array<i64: 2, 1, 32>}, {transform_indices = @transform_6, window_bounds = array<i64: 2, 1, 32>}, {transform_indices = @transform_7, window_bounds = array<i64: 2, 1, 32>}, {transform_indices = @transform_8, window_bounds = array<i64: 2, 50>}, {transform_indices = @transform_9, window_bounds = array<i64: 2, 1>}, {transform_indices = @transform_10, window_bounds = array<i64: 2, 1>}, {transform_indices = @transform_11, window_bounds = array<i64: 2, 1>}, {transform_indices = @transform_12, window_bounds = array<i64: 2, 1>}]} {
    %c0 = arith.constant 0 : index
    %c0_0 = arith.constant 0 : index
    %c0_1 = arith.constant 0 : index
    %0 = vector.load %arg7[%c0, %c0_0, %c0_1] : memref<2x1x32xf32, #tpu.memory_space<vmem>>, vector<2x1x32xf32>
    %c0_2 = arith.constant 0 : index
    %c0_3 = arith.constant 0 : index
    %c0_4 = arith.constant 0 : index
    %1 = vector.load %arg8[%c0_2, %c0_3, %c0_4] : memref<2x1x32xf32, #tpu.memory_space<vmem>>, vector<2x1x32xf32>
    %c0_5 = arith.constant 0 : index
    %c0_6 = arith.constant 0 : index
    %c0_7 = arith.constant 0 : index
    %2 = vector.load %arg1[%c0_5, %c0_6, %c0_7] : memref<2x1x32xf32, #tpu.memory_space<vmem>>, vector<2x1x32xf32>
    %c0_8 = arith.constant 0 : index
    %c0_9 = arith.constant 0 : index
    %c0_10 = arith.constant 0 : index
    %3 = vector.load %arg2[%c0_8, %c0_9, %c0_10] : memref<2x1x32xf32, #tpu.memory_space<vmem>>, vector<2x1x32xf32>
    %c0_11 = arith.constant 0 : index
    %c0_12 = arith.constant 0 : index
    %c0_13 = arith.constant 0 : index
    %4 = vector.load %arg3[%c0_11, %c0_12, %c0_13] : memref<2x50x32xf32, #tpu.memory_space<vmem>>, vector<2x50x32xf32>
    %c0_14 = arith.constant 0 : index
    %c0_15 = arith.constant 0 : index
    %c0_16 = arith.constant 0 : index
    %5 = vector.load %arg4[%c0_14, %c0_15, %c0_16] : memref<2x50x32xf32, #tpu.memory_space<vmem>>, vector<2x50x32xf32>
    %6 = arith.mulf %2, %0 : vector<2x1x32xf32>
    %7 = arith.mulf %3, %1 : vector<2x1x32xf32>
    %8 = arith.subf %6, %7 : vector<2x1x32xf32>
    %9 = arith.mulf %2, %1 : vector<2x1x32xf32>
    %10 = arith.mulf %3, %0 : vector<2x1x32xf32>
    %11 = arith.addf %9, %10 : vector<2x1x32xf32>
    %12 = vector.broadcast %0 : vector<2x1x32xf32> to vector<2x50x32xf32>
    %13 = arith.mulf %4, %12 : vector<2x50x32xf32>
    %14 = vector.broadcast %1 : vector<2x1x32xf32> to vector<2x50x32xf32>
    %15 = arith.mulf %5, %14 : vector<2x50x32xf32>
    %16 = arith.subf %13, %15 : vector<2x50x32xf32>
    %17 = vector.broadcast %1 : vector<2x1x32xf32> to vector<2x50x32xf32>
    %18 = arith.mulf %4, %17 : vector<2x50x32xf32>
    %19 = vector.broadcast %0 : vector<2x1x32xf32> to vector<2x50x32xf32>
    %20 = arith.mulf %5, %19 : vector<2x50x32xf32>
    %21 = arith.addf %18, %20 : vector<2x50x32xf32>
    %c0_17 = arith.constant 0 : index
    %c0_18 = arith.constant 0 : index
    %c0_19 = arith.constant 0 : index
    %22 = vector.load %arg5[%c0_17, %c0_18, %c0_19] : memref<2x1x32xf32, #tpu.memory_space<vmem>>, vector<2x1x32xf32>
    %c0_20 = arith.constant 0 : index
    %c0_21 = arith.constant 0 : index
    %c0_22 = arith.constant 0 : index
    %23 = vector.load %arg6[%c0_20, %c0_21, %c0_22] : memref<2x1x32xf32, #tpu.memory_space<vmem>>, vector<2x1x32xf32>
    %24 = arith.addf %8, %22 : vector<2x1x32xf32>
    %25 = vector.broadcast %24 : vector<2x1x32xf32> to vector<2x50x32xf32>
    %26 = arith.subf %25, %16 : vector<2x50x32xf32>
    %27 = math.absf %26 : vector<2x50x32xf32>
    %28 = arith.addf %11, %23 : vector<2x1x32xf32>
    %29 = vector.broadcast %28 : vector<2x1x32xf32> to vector<2x50x32xf32>
    %30 = arith.addf %29, %21 : vector<2x50x32xf32>
    %31 = math.absf %30 : vector<2x50x32xf32>
    %32 = arith.addf %27, %31 : vector<2x50x32xf32>
    %cst = arith.constant dense<0.000000e+00> : vector<2x50xf32>
    %33 = vector.multi_reduction <add>, %32, %cst [2] : vector<2x50x32xf32> to vector<2x50xf32>
    %c0_23 = arith.constant 0 : index
    %c0_24 = arith.constant 0 : index
    %34 = vector.load %arg9[%c0_23, %c0_24] : memref<2x50xf32, #tpu.memory_space<vmem>>, vector<2x50xf32>
    tpu.vector_store %arg9[%c0_23, %c0_24], %33 {strides = array<i32>} : memref<2x50xf32, #tpu.memory_space<vmem>>, vector<2x50xf32>,
    %35 = math.absf %8 : vector<2x1x32xf32>
    %cst_25 = arith.constant dense<0.000000e+00> : vector<2x1xf32>
    %36 = vector.multi_reduction <add>, %35, %cst_25 [2] : vector<2x1x32xf32> to vector<2x1xf32>
    %cst_26 = arith.constant dense<0.000000e+00> : vector<2xf32>
    %37 = vector.multi_reduction <add>, %36, %cst_26 [1] : vector<2x1xf32> to vector<2xf32>
    %38 = vector.shape_cast %37 : vector<2xf32> to vector<2x1xf32>
    %c0_27 = arith.constant 0 : index
    %c0_28 = arith.constant 0 : index
    %39 = vector.load %arg10[%c0_27, %c0_28] : memref<2x1xf32, #tpu.memory_space<vmem>>, vector<2x1xf32>
    tpu.vector_store %arg10[%c0_27, %c0_28], %38 {strides = array<i32>} : memref<2x1xf32, #tpu.memory_space<vmem>>, vector<2x1xf32>,
    %40 = math.absf %16 : vector<2x50x32xf32>
    %cst_29 = arith.constant dense<0.000000e+00> : vector<2x50xf32>
    %41 = vector.multi_reduction <add>, %40, %cst_29 [2] : vector<2x50x32xf32> to vector<2x50xf32>
    %cst_30 = arith.constant dense<0.000000e+00> : vector<2xf32>
    %42 = vector.multi_reduction <add>, %41, %cst_30 [1] : vector<2x50xf32> to vector<2xf32>
    %43 = vector.shape_cast %42 : vector<2xf32> to vector<2x1xf32>
    %c0_31 = arith.constant 0 : index
    %c0_32 = arith.constant 0 : index
    %44 = vector.load %arg11[%c0_31, %c0_32] : memref<2x1xf32, #tpu.memory_space<vmem>>, vector<2x1xf32>
    tpu.vector_store %arg11[%c0_31, %c0_32], %43 {strides = array<i32>} : memref<2x1xf32, #tpu.memory_space<vmem>>, vector<2x1xf32>,
    %45 = math.absf %11 : vector<2x1x32xf32>
    %cst_33 = arith.constant dense<0.000000e+00> : vector<2x1xf32>
    %46 = vector.multi_reduction <add>, %45, %cst_33 [2] : vector<2x1x32xf32> to vector<2x1xf32>
    %cst_34 = arith.constant dense<0.000000e+00> : vector<2xf32>
    %47 = vector.multi_reduction <add>, %46, %cst_34 [1] : vector<2x1xf32> to vector<2xf32>
    %48 = vector.shape_cast %47 : vector<2xf32> to vector<2x1xf32>
    %c0_35 = arith.constant 0 : index
    %c0_36 = arith.constant 0 : index
    %49 = vector.load %arg12[%c0_35, %c0_36] : memref<2x1xf32, #tpu.memory_space<vmem>>, vector<2x1xf32>
    tpu.vector_store %arg12[%c0_35, %c0_36], %48 {strides = array<i32>} : memref<2x1xf32, #tpu.memory_space<vmem>>, vector<2x1xf32>,
    %50 = math.absf %21 : vector<2x50x32xf32>
    %cst_37 = arith.constant dense<0.000000e+00> : vector<2x50xf32>
    %51 = vector.multi_reduction <add>, %50, %cst_37 [2] : vector<2x50x32xf32> to vector<2x50xf32>
    %cst_38 = arith.constant dense<0.000000e+00> : vector<2xf32>
    %52 = vector.multi_reduction <add>, %51, %cst_38 [1] : vector<2x50xf32> to vector<2xf32>
    %53 = vector.shape_cast %52 : vector<2xf32> to vector<2x1xf32>
    %c0_39 = arith.constant 0 : index
    %c0_40 = arith.constant 0 : index
    %54 = vector.load %arg13[%c0_39, %c0_40] : memref<2x1xf32, #tpu.memory_space<vmem>>, vector<2x1xf32>
    tpu.vector_store %arg13[%c0_39, %c0_40], %53 {strides = array<i32>} : memref<2x1xf32, #tpu.memory_space<vmem>>, vector<2x1xf32>,
    return
  }
  func.func @transform_0(%arg0: i32) -> (i32, i32, i32) {
    %c0_i32 = arith.constant 0 : i32
    %c0_i32_0 = arith.constant 0 : i32
    %c0_i32_1 = arith.constant 0 : i32
    return %arg0, %c0_i32, %c0_i32_0 : i32, i32, i32
  }
  func.func @transform_1(%arg0: i32) -> (i32, i32, i32) {
    %c0_i32 = arith.constant 0 : i32
    %c0_i32_0 = arith.constant 0 : i32
    %c0_i32_1 = arith.constant 0 : i32
    return %arg0, %c0_i32, %c0_i32_0 : i32, i32, i32
  }
  func.func @transform_2(%arg0: i32) -> (i32, i32, i32) {
    %c0_i32 = arith.constant 0 : i32
    %c0_i32_0 = arith.constant 0 : i32
    %c0_i32_1 = arith.constant 0 : i32
    return %arg0, %c0_i32, %c0_i32_0 : i32, i32, i32
  }
  func.func @transform_3(%arg0: i32) -> (i32, i32, i32) {
    %c0_i32 = arith.constant 0 : i32
    %c0_i32_0 = arith.constant 0 : i32
    %c0_i32_1 = arith.constant 0 : i32
    return %arg0, %c0_i32, %c0_i32_0 : i32, i32, i32
  }
  func.func @transform_4(%arg0: i32) -> (i32, i32, i32) {
    %c0_i32 = arith.constant 0 : i32
    %c0_i32_0 = arith.constant 0 : i32
    %c0_i32_1 = arith.constant 0 : i32
    return %arg0, %c0_i32, %c0_i32_0 : i32, i32, i32
  }
  func.func @transform_5(%arg0: i32) -> (i32, i32, i32) {
    %c0_i32 = arith.constant 0 : i32
    %c0_i32_0 = arith.constant 0 : i32
    %c0_i32_1 = arith.constant 0 : i32
    return %arg0, %c0_i32, %c0_i32_0 : i32, i32, i32
  }
  func.func @transform_6(%arg0: i32) -> (i32, i32, i32) {
    %c0_i32 = arith.constant 0 : i32
    %c0_i32_0 = arith.constant 0 : i32
    %c0_i32_1 = arith.constant 0 : i32
    return %arg0, %c0_i32, %c0_i32_0 : i32, i32, i32
  }
  func.func @transform_7(%arg0: i32) -> (i32, i32, i32) {
    %c0_i32 = arith.constant 0 : i32
    %c0_i32_0 = arith.constant 0 : i32
    %c0_i32_1 = arith.constant 0 : i32
    return %arg0, %c0_i32, %c0_i32_0 : i32, i32, i32
  }
  func.func @transform_8(%arg0: i32) -> (i32, i32) {
    %c0_i32 = arith.constant 0 : i32
    %c0_i32_0 = arith.constant 0 : i32
    return %arg0, %c0_i32 : i32, i32
  }
  func.func @transform_9(%arg0: i32) -> (i32, i32) {
    %c0_i32 = arith.constant 0 : i32
    %c0_i32_0 = arith.constant 0 : i32
    return %arg0, %c0_i32 : i32, i32
  }
  func.func @transform_10(%arg0: i32) -> (i32, i32) {
    %c0_i32 = arith.constant 0 : i32
    %c0_i32_0 = arith.constant 0 : i32
    return %arg0, %c0_i32 : i32, i32
  }
  func.func @transform_11(%arg0: i32) -> (i32, i32) {
    %c0_i32 = arith.constant 0 : i32
    %c0_i32_0 = arith.constant 0 : i32
    return %arg0, %c0_i32 : i32, i32
  }
  func.func @transform_12(%arg0: i32) -> (i32, i32) {
    %c0_i32 = arith.constant 0 : i32
    %c0_i32_0 = arith.constant 0 : i32
    return %arg0, %c0_i32 : i32, i32
  }
}

</mosaic_0001>

<bundles_post_ra>
// kernel: tpu_custom_call.1
= control target key start
LH: loop header
LB: loop body
LE: loop exit
PB: predicated region body
PF: predicated region fallthrough
CT: control target
= control target key end

     0   :  { %vm269_vm0 = vcmask 261120   ;;  %s1279_s0 = inlined_call_operand.vmem [shape: f32[2,1,32], index: 0, kind: input, shape index: {}]   ;;  %s1280_s1 = inlined_call_operand.vmem [shape: f32[2,1,32], index: 1, kind: input, shape index: {}]   ;;  %s1281_s2 = inlined_call_operand.vmem [shape: f32[2,50,32], index: 2, kind: input, shape index: {}]   ;;  %s1282_s3 = inlined_call_operand.vmem [shape: f32[2,50,32], index: 3, kind: input, shape index: {}]   ;;  %s1283_s4 = inlined_call_operand.vmem [shape: f32[2,1,32], index: 4, kind: input, shape index: {}]   ;;  %s1284_s5 = inlined_call_operand.vmem [shape: f32[2,1,32], index: 5, kind: input, shape index: {}]   ;;  %s1285_s6 = inlined_call_operand.vmem [shape: f32[2,1,32], index: 6, kind: input, shape index: {}]   ;;  %s1286_s7 = inlined_call_operand.vmem [shape: f32[2,1,32], index: 7, kind: input, shape index: {}]   ;;  %s1287_s8 = inlined_call_operand.hbm [shape: f32[2,50], index: 8, kind: output, shape index: {0}]   ;;  %s1288_s9 = inlined_call_operand.vmem [shape: f32[2,1], index: 9, kind: output, shape index: {1}]   ;;  %s1289_s10 = inlined_call_operand.vmem [shape: f32[2,1], index: 10, kind: output, shape index: {2}]   ;;  %s1290_s11 = inlined_call_operand.vmem [shape: f32[2,1], index: 11, kind: output, shape index: {3}]   ;;  %s1291_s12 = inlined_call_operand.vmem [shape: f32[2,1], index: 12, kind: output, shape index: {4}]  }
   0x1   :  { %v35_v0 = vld [vmem:[%s1285_s6] sm:$0x1]  ;;  %v45_v14 = vld [vmem:[%s1281_s2 + $0x10] sm:$0xff]  ;;  %v48_v30 = vld [vmem:[%s1281_s2 + $0x28] sm:$0xff] }
   0x2   :  { %v37_v1 = vld [vmem:[%s1286_s7] sm:$0x1]  ;;  %v59_v15 = vld [vmem:[%s1282_s3 + $0x10] sm:$0xff]  ;;  %v62_v31 = vld [vmem:[%s1282_s3 + $0x28] sm:$0xff] }
   0x3   :  { %v39_v2 = vld [vmem:[%s1279_s0] sm:$0x1]  ;;  %v46_v52 = vld [vmem:[%s1281_s2 + $0x18] sm:$0xff] }
   0x4   :  { %v41_v3 = vld [vmem:[%s1280_s1] sm:$0x1]  ;;  %v71_v6 = vmul.f32 %v39_v2, %v35_v0  ;;  %v77_v7 = vmul.f32 %v39_v2, %v37_v1  ;;  %v60_v53 = vld [vmem:[%s1282_s3 + $0x18] sm:$0xff]  ;;  %v44_v2 = vld [vmem:[%s1281_s2 + $0x8] sm:$0xff] }
   0x5   :  { %v47_v4 = vld [vmem:[%s1281_s2 + $0x20] sm:$0xff]  ;;  %v73_v8 = vmul.f32 %v41_v3, %v37_v1  ;;  %v79_v9 = vmul.f32 %v41_v3, %v35_v0 }
   0x6   :  { %v61_v5 = vld [vmem:[%s1282_s3 + $0x20] sm:$0xff] }
   0x7   :  { %v760_v10 = vld [vmem:[%s1285_s6] ss:$0 sm:$0xff]  ;;  %v779_v16 = vsub.f32 %v71_v6, %v73_v8  ;;  %v781_v17 = vadd.f32 %v79_v9, %v77_v7 }
   0x8   :  { %v765_v11 = vld [vmem:[%s1286_s7] ss:$0 sm:$0xff]  ;;  %v93_v18 = vmul.f32 %v760_v10, %v47_v4  ;;  %v155_v22 = vmul.f32 %v760_v10, %v61_v5  ;;  %v91_v23 = vmul.f32 %v760_v10, %v45_v14  ;;  %v153_v34 = vmul.f32 %v760_v10, %v59_v15 }
   0x9   :  { %v179_v12 = vld [vmem:[%s1283_s4] sm:$0x1]  ;;  %v113_v19 = vmul.f32 %v765_v11, %v61_v5  ;;  %v141_v21 = vmul.f32 %v765_v11, %v47_v4  ;;  %v111_v24 = vmul.f32 %v765_v11, %v59_v15  ;;  %v139_v29 = vmul.f32 %v765_v11, %v45_v14 }
   0xa   :  { %v181_v13 = vld [vmem:[%s1284_s5] sm:$0x1]  ;;  %v183_v27 = vadd.f32 %v179_v12, %v779_v16  ;;  %v94_v42 = vmul.f32 %v760_v10, %v48_v30  ;;  %v114_v43 = vmul.f32 %v765_v11, %v62_v31  ;;  %v142_v51 = vmul.f32 %v765_v11, %v48_v30 }
   0xb   :  { %v43_v20 = vld [vmem:[%s1281_s2] sm:$0xff]  ;;  %v795_v26 = vsub.f32 %v93_v18, %v113_v19  ;;  %v219_v28 = vadd.f32 %v181_v13, %v781_v17  ;;  %v806_v32 = vadd.f32 %v155_v22, %v141_v21  ;;  %v808_v33 = vsub.f32 %v91_v23, %v111_v24 }
   0xc   :  { %v57_v25 = vld [vmem:[%s1282_s3] sm:$0xff]  ;;  %v89_v35 = vmul.f32 %v760_v10, %v43_v20  ;;  %v812_v36 = vperm.slane %v183_v27, 0  ;;  %v137_v39 = vmul.f32 %v765_v11, %v43_v20  ;;  %v818_v40 = vadd.f32 %v153_v34, %v139_v29 }
   0xd   :  { %v814_v37 = vperm.slane %v219_v28, 0  ;;  %v109_v38 = vmul.f32 %v765_v11, %v57_v25  ;;  %v151_v41 = vmul.f32 %v760_v10, %v57_v25  ;;  %v835_v50 = vsub.f32 %v94_v42, %v114_v43 }
   0xe   :  { %v195_v44 = vsub.f32 %v812_v36, %v795_v26  ;;  %v193_v46 = vsub.f32 %v812_v36, %v808_v33  ;;  %v156_v60 = vmul.f32 %v760_v10, %v62_v31  ;;  %v92_v0 = vmul.f32 %v760_v10, %v46_v52 }
   0xf   :  { %v231_v45 = vadd.f32 %v814_v37, %v806_v32  ;;  %v829_v47 = vsub.f32 %v89_v35, %v109_v38  ;;  %v229_v48 = vadd.f32 %v814_v37, %v818_v40  ;;  %v833_v49 = vadd.f32 %v151_v41, %v137_v39 }
  0x10   :  { %v209_v54 = vand.u32 2147483647, %v195_v44  ;;  %v207_v56 = vand.u32 2147483647, %v193_v46  ;;  %v196_v61 = vsub.f32 %v812_v36, %v835_v50  ;;  %v112_v1 = vmul.f32 %v765_v11, %v60_v53 }
  0x11   :  { %v245_v55 = vand.u32 2147483647, %v231_v45  ;;  %v191_v57 = vsub.f32 %v812_v36, %v829_v47  ;;  %v243_v58 = vand.u32 2147483647, %v229_v48  ;;  %v227_v59 = vadd.f32 %v814_v37, %v833_v49 }
  0x13   :  { %v259_v62 = vadd.f32 %v245_v55, %v209_v54  ;;  %v205_v63 = vand.u32 2147483647, %v191_v57 }
  0x14   :  { %18 = vsyncpa [#allocation3], 0  ;;  %v257_v3 = vadd.f32 %v243_v58, %v207_v56  ;;  %v241_v4 = vand.u32 2147483647, %v227_v59  ;;  %v856_v5 = vadd.f32 %v156_v60, %v142_v51  ;;  %v210_v6 = vand.u32 2147483647, %v196_v61 }
  0x15   :  { %v58_v7 = vld [vmem:[%s1282_s3 + $0x8] sm:$0xff]  ;;  %v282_v8 = vsel %vm269_vm0, %v259_v62, 0.0  ;;  %v862_v9 = vsub.f32 %v92_v0, %v112_v1  ;;  %v140_v12 = vmul.f32 %v765_v11, %v46_v52  ;;  %v154_v13 = vmul.f32 %v760_v10, %v60_v53  ;;  %v36_v14 = vld [vmem:[%s1285_s6 + $0x1] sm:$0x1]  ;;  %v64_v0 = vld [vmem:[%s1282_s3 + $0x38] sm:$0xff]  ;;  %s617_s28 = sshll.u32 %s1287_s8, 4  ;;  %s618_s28 = int_to_ptr.hbm [resolvable:$true] %s617_s28 }
  0x16   :  { %v40_v15 = vld [vmem:[%s1279_s0 + $0x1] sm:$0x1]  ;;  %283 = vadd.xlane.f32.xlu2 %v282_v8  ;;  %v276_v18 = vsel %vm269_vm0, %v257_v3, 0.0  ;;  %v255_v19 = vadd.f32 %v241_v4, %v205_v63  ;;  %v232_v20 = vadd.f32 %v814_v37, %v856_v5  ;;  %v90_v21 = vmul.f32 %v760_v10, %v44_v2  ;;  %v50_v63 = vld [vmem:[%s1281_s2 + $0x38] sm:$0xff] }
  0x17   :  { %v38_v22 = vld [vmem:[%s1286_s7 + $0x1] sm:$0x1]  ;;  %277 = vadd.xlane.f32.xlu1 %v276_v18  ;;  %v882_v24 = vadd.f32 %v154_v13, %v140_v12  ;;  %v194_v25 = vsub.f32 %v812_v36, %v862_v9  ;;  %v110_v27 = vmul.f32 %v765_v11, %v58_v7  ;;  %v138_v28 = vmul.f32 %v765_v11, %v44_v2  ;;  %v49_v13 = vld [vmem:[%s1281_s2 + $0x30] sm:$0x3] }
  0x18   :  { %v42_v23 = vld [vmem:[%s1280_s1 + $0x1] sm:$0x1]  ;;  %v270_v30 = vsel %vm269_vm0, %v255_v19, 0.0  ;;  %v246_v31 = vand.u32 2147483647, %v232_v20  ;;  %v152_v34 = vmul.f32 %v760_v10, %v58_v7  ;;  %v72_v38 = vmul.f32 %v40_v15, %v36_v14 }
  0x19   :  { %v891_v29 = vld [vmem:[%s1285_s6 + $0x1] ss:$0 sm:$0xff]  ;;  %271 = vadd.xlane.f32.xlu0 %v270_v30  ;;  %v208_v41 = vand.u32 2147483647, %v194_v25  ;;  %v230_v42 = vadd.f32 %v814_v37, %v882_v24  ;;  %v905_v43 = vsub.f32 %v90_v21, %v110_v27  ;;  %v74_v45 = vmul.f32 %v42_v23, %v38_v22 }
  0x1a   :  { %v51_v35 = vld [vmem:[%s1281_s2 + $0x40] sm:$0xff]  ;;  %v260_v46 = vadd.f32 %v246_v31, %v210_v6  ;;  %v910_v48 = vadd.f32 %v152_v34, %v138_v28  ;;  %v78_v51 = vmul.f32 %v40_v15, %v38_v22  ;;  %v80_v52 = vmul.f32 %v42_v23, %v36_v14  ;;  %v63_v14 = vld [vmem:[%s1282_s3 + $0x30] sm:$0x3]  ;;  %v54_v34 = vld [vmem:[%s1281_s2 + $0x58] sm:$0xff] }
  0x1b   :  { %v901_v39 = vld [vmem:[%s1286_s7 + $0x1] ss:$0 sm:$0xff]  ;;  %v244_v53 = vand.u32 2147483647, %v230_v42  ;;  %v192_v54 = vsub.f32 %v812_v36, %v905_v43  ;;  %v914_v55 = vsub.f32 %v72_v38, %v74_v45  ;;  %v97_v56 = vmul.f32 %v891_v29, %v51_v35 }
  0x1c   :  { %v65_v44 = vld [vmem:[%s1282_s3 + $0x40] sm:$0xff]  ;;  %v285_v59 = vsel %vm269_vm0, %v260_v46, 0.0  ;;  %v228_v60 = vadd.f32 %v814_v37, %v910_v48  ;;  %v926_v61 = vadd.f32 %v80_v52, %v78_v51  ;;  %v145_v3 = vmul.f32 %v901_v39, %v51_v35  ;;  %v68_v52 = vld [vmem:[%s1282_s3 + $0x58] sm:$0xff] }
  0x1d   :  { %v180_v57 = vld [vmem:[%s1283_s4 + $0x1] sm:$0x1]  ;;  %v117_v62 = vmul.f32 %v901_v39, %v65_v44  ;;  %v258_v1 = vadd.f32 %v244_v53, %v208_v41  ;;  %v206_v2 = vand.u32 2147483647, %v192_v54  ;;  %v159_v4 = vmul.f32 %v891_v29, %v65_v44 }
  0x1e   :  { %v182_v58 = vld [vmem:[%s1284_s5 + $0x1] sm:$0x1]  ;;  %286 = vadd.xlane.f32.xlu2 %v285_v59  ;;  %v242_v6 = vand.u32 2147483647, %v228_v60  ;;  %v184_v8 = vadd.f32 %v180_v57, %v914_v55  ;;  %v96_v19 = vmul.f32 %v891_v29, %v50_v63  ;;  %v116_v20 = vmul.f32 %v901_v39, %v64_v0  ;;  %v67_v60 = vld [vmem:[%s1282_s3 + $0x50] sm:$0xff] }
  0x1f   :  { %v937_v7 = vsub.f32 %v97_v56, %v117_v62  ;;  %v220_v12 = vadd.f32 %v182_v58, %v926_v61  ;;  %v279_v15 = vsel %vm269_vm0, %v258_v1, 0.0  ;;  %v948_v18 = vadd.f32 %v159_v4, %v145_v3 }
  0x20   :  { %280 = vadd.xlane.f32.xlu1 %v279_v15  ;;  %v256_v21 = vadd.f32 %v242_v6, %v206_v2  ;;  %v952_v22 = vperm.slane %v184_v8, 0  ;;  %v144_v25 = vmul.f32 %v901_v39, %v50_v63  ;;  %v957_v27 = vsub.f32 %v96_v19, %v116_v20  ;;  %v66_v15 = vld [vmem:[%s1282_s3 + $0x48] sm:$0xff] }
  0x21   :  { %v954_v23 = vperm.slane %v220_v12, 0  ;;  %v158_v28 = vmul.f32 %v891_v29, %v64_v0  ;;  %v95_v30 = vmul.f32 %v760_v10, %v49_v13  ;;  %v115_v31 = vmul.f32 %v765_v11, %v63_v14 }
  0x22   :  { %v273_v35 = vsel %vm269_vm0, %v256_v21, 0.0  ;;  %v199_v38 = vsub.f32 %v952_v22, %v937_v7  ;;  %v143_v42 = vmul.f32 %v765_v11, %v49_v13  ;;  %v198_v45 = vsub.f32 %v952_v22, %v957_v27  ;;  %v53_v11 = vld [vmem:[%s1281_s2 + $0x50] sm:$0xff] }
  0x23   :  { %v235_v41 = vadd.f32 %v954_v23, %v948_v18  ;;  %274 = vadd.xlane.f32.xlu0 %v273_v35  ;;  %v971_v44 = vadd.f32 %v158_v28, %v144_v25  ;;  %v975_v46 = vsub.f32 %v95_v30, %v115_v31  ;;  %v157_v51 = vmul.f32 %v760_v10, %v63_v14 }
  0x24   :  { %v213_v53 = vand.u32 2147483647, %v199_v38  ;;  %vm288_vm1 = vcmask 254976   ;;  %v100_v56 = vmul.f32 %v891_v29, %v54_v34  ;;  %v212_v57 = vand.u32 2147483647, %v198_v45 }
  0x25   :  { %v249_v54 = vand.u32 2147483647, %v235_v41  ;;  %v234_v58 = vadd.f32 %v954_v23, %v971_v44  ;;  %v987_v59 = vadd.f32 %v157_v51, %v143_v42  ;;  %v197_v10 = vsub.f32 %v812_v36, %v975_v46  ;;  %v52_v36 = vld [vmem:[%s1281_s2 + $0x48] sm:$0xff] }
  0x26   :  { %v120_v63 = vmul.f32 %v901_v39, %v68_v52  ;;  %v148_v0 = vmul.f32 %v901_v39, %v54_v34  ;;  %v162_v1 = vmul.f32 %v891_v29, %v68_v52  ;;  %v99_v6 = vmul.f32 %v891_v29, %v53_v11 }
  0x27   :  { %v263_v62 = vadd.f32 %v249_v54, %v213_v53  ;;  %v248_v2 = vand.u32 2147483647, %v234_v58  ;;  %v211_v3 = vand.u32 2147483647, %v197_v10  ;;  %v233_v4 = vadd.f32 %v814_v37, %v987_v59  ;;  %v56_v53 = vld [vmem:[%s1281_s2 + $0x68] sm:$0x3] }
  0x28   :  { %v1004_v12 = vsub.f32 %v100_v56, %v120_v63  ;;  %v1006_v13 = vadd.f32 %v162_v1, %v148_v0  ;;  %v119_v14 = vmul.f32 %v901_v39, %v67_v60  ;;  %v147_v20 = vmul.f32 %v901_v39, %v53_v11  ;;  %v70_v58 = vld [vmem:[%s1282_s3 + $0x68] sm:$0x3] }
  0x29   :  { %v295_v8 = vsel %vm269_vm0, %v263_v62, 0.0  ;;  %v262_v37 = vadd.f32 %v248_v2, %v212_v57  ;;  %v247_v19 = vand.u32 2147483647, %v233_v4  ;;  %v161_v21 = vmul.f32 %v891_v29, %v67_v60  ;;  %v69_v4 = vld [vmem:[%s1282_s3 + $0x60] sm:$0xff] }
  0x2a   :  { %296 = vadd.xlane.f32.xlu2 %v295_v8  ;;  %v202_v25 = vsub.f32 %v952_v22, %v1004_v12  ;;  %v238_v28 = vadd.f32 %v954_v23, %v1006_v13  ;;  %v1018_v30 = vsub.f32 %v99_v6, %v119_v14  ;;  %v98_v31 = vmul.f32 %v891_v29, %v52_v36 }
  0x2b   :  { %v292_v34 = vsel %vm269_vm0, %v262_v37, 0.0  ;;  %v261_v35 = vadd.f32 %v247_v19, %v211_v3  ;;  %v1022_v38 = vadd.f32 %v161_v21, %v147_v20  ;;  %v118_v41 = vmul.f32 %v901_v39, %v66_v15  ;;  %v55_v3 = vld [vmem:[%s1281_s2 + $0x60] sm:$0xff] }
  0x2c   :  { %293 = vadd.xlane.f32.xlu1 %v292_v34  ;;  %v216_v42 = vand.u32 2147483647, %v202_v25  ;;  %v252_v45 = vand.u32 2147483647, %v238_v28  ;;  %v201_v51 = vsub.f32 %v952_v22, %v1018_v30  ;;  %v146_v52 = vmul.f32 %v901_v39, %v52_v36 }
  0x2d   :  { %v289_v54 = vsel %vm288_vm1, %v261_v35, 0.0  ;;  %v237_v56 = vadd.f32 %v954_v23, %v1022_v38  ;;  %v1034_v11 = vsub.f32 %v98_v31, %v118_v41  ;;  %v160_v57 = vmul.f32 %v891_v29, %v66_v15 }
  0x2e   :  { %290 = vadd.xlane.f32.xlu0 %v289_v54  ;;  %v266_v10 = vadd.f32 %v252_v45, %v216_v42  ;;  %v215_v60 = vand.u32 2147483647, %v201_v51  ;;  %v372_v62 = vand.u32 2147483647, %v779_v16  ;;  %v102_v2 = vmul.f32 %v891_v29, %v56_v53 }
  0x2f   :  { %v251_v63 = vand.u32 2147483647, %v237_v56  ;;  %v1041_v0 = vadd.f32 %v160_v57, %v146_v52  ;;  %v200_v1 = vsub.f32 %v952_v22, %v1034_v11  ;;  %vm374_vm2 = vcmask 253952  }
  0x30   :  { %v304_v6 = vsel %vm269_vm0, %v266_v10, 0.0  ;;  %v122_v16 = vmul.f32 %v901_v39, %v70_v58  ;;  %v150_v36 = vmul.f32 %v901_v39, %v56_v53  ;;  %v164_v37 = vmul.f32 %v891_v29, %v70_v58 }
  0x31   :  { %v265_v8 = vadd.f32 %v251_v63, %v215_v60  ;;  %v214_v14 = vand.u32 2147483647, %v200_v1  ;;  %v236_v15 = vadd.f32 %v954_v23, %v1041_v0  ;;  %v101_v20 = vmul.f32 %v891_v29, %v55_v3 }
  0x32   :  { %305 = vadd.xlane.f32.xlu2 %v304_v6  ;;  %v1058_v19 = vsub.f32 %v102_v2, %v122_v16  ;;  %v121_v21 = vmul.f32 %v901_v39, %v69_v4  ;;  %v149_v25 = vmul.f32 %v901_v39, %v55_v3  ;;  %v1064_v34 = vadd.f32 %v164_v37, %v150_v36 }
  0x33   :  { %v301_v28 = vsel %vm269_vm0, %v265_v8, 0.0  ;;  %v250_v31 = vand.u32 2147483647, %v236_v15  ;;  %v163_v35 = vmul.f32 %v891_v29, %v69_v4  ;;  %v375_v39 = vsel %vm374_vm2, %v372_v62, 0.0 }
  0x34   :  { %302 = vadd.xlane.f32.xlu1 %v301_v28  ;;  %v204_v41 = vsub.f32 %v952_v22, %v1058_v19  ;;  %v1069_v42 = vsub.f32 %v101_v20, %v121_v21  ;;  %v240_v51 = vadd.f32 %v954_v23, %v1064_v34  ;;  %v391_v63 = vand.u32 2147483647, %v905_v43 }
  0x35   :  { %v264_v45 = vadd.f32 %v250_v31, %v214_v14  ;;  %v1073_v52 = vadd.f32 %v163_v35, %v149_v25  ;;  %v373_v4 = vand.u32 2147483647, %v914_v55  ;;  %v508_v6 = vand.u32 2147483647, %v833_v49 }
  0x36   :  { %v218_v53 = vand.u32 2147483647, %v204_v41  ;;  %v203_v54 = vsub.f32 %v952_v22, %v1069_v42  ;;  %v254_v56 = vand.u32 2147483647, %v240_v51  ;;  %v390_v22 = vand.u32 2147483647, %v829_v47 }
  0x37   :  { %v298_v29 = vsel %vm269_vm0, %v264_v45, 0.0  ;;  %v239_v57 = vadd.f32 %v954_v23, %v1073_v52  ;;  %v407_v3 = vsel %vm269_vm0, %v391_v63, 0.0  ;;  %v378_v43 = vsel %vm374_vm2, %v373_v4, 0.0 }
  0x38   :  { %299 = vadd.xlane.f32.xlu0 %v298_v29  ;;  %v217_v58 = vand.u32 2147483647, %v203_v54  ;;  %v268_v10 = vadd.f32 %v254_v56, %v218_v53  ;;  %v404_v23 = vsel %vm269_vm0, %v390_v22, 0.0  ;;  %v398_v16 = vand.u32 2147483647, %v937_v7 }
  0x39   :  { %v253_v60 = vand.u32 2147483647, %v239_v57  ;;  %v522_v36 = vsel %vm269_vm0, %v508_v6, 0.0  ;;  %v397_v8 = vand.u32 2147483647, %v957_v27  ;;  %v327_v4 = vlaneseq }
  0x3a   :  { %376 = vadd.xlane.f32.xlu2 %v375_v39  ;;  %v310_v1 = vsel %vm288_vm1, %v268_v10, 0.0  ;;  %v428_v47 = vsel %vm269_vm0, %v398_v16, 0.0  ;;  %v516_v14 = vand.u32 2147483647, %v948_v18  ;;  %v515_v49 = vand.u32 2147483647, %v971_v44 }
  0x3b   :  { %v267_v62 = vadd.f32 %v253_v60, %v217_v58  ;;  %v425_v55 = vsel %vm269_vm0, %v397_v8, 0.0  ;;  %v509_v37 = vand.u32 2147483647, %v910_v48  ;;  %v510_v20 = vand.u32 2147483647, %v818_v40 }
  0x3c   :  { %311 = vadd.xlane.f32.xlu1 %v310_v1  ;;  %v546_v15 = vsel %vm269_vm0, %v516_v14, 0.0  ;;  %v543_v7 = vsel %vm269_vm0, %v515_v49, 0.0  ;;  %v399_v18 = vand.u32 2147483647, %v1034_v11  ;;  %v392_v25 = vand.u32 2147483647, %v808_v33 }
  0x3d   :  { %v307_v2 = vsel %vm269_vm0, %v267_v62, 0.0  ;;  %v525_v27 = vsel %vm269_vm0, %v509_v37, 0.0  ;;  %v528_v21 = vsel %vm269_vm0, %v510_v20, 0.0  ;;  %v400_v28 = vand.u32 2147483647, %v1018_v30 }
  0x3e   :  { %v431_v44 = vsel %vm269_vm0, %v399_v18, 0.0  ;;  %v410_v48 = vsel %vm269_vm0, %v392_v25, 0.0  ;;  %v393_v40 = vand.u32 2147483647, %v862_v9  ;;  %v517_v35 = vand.u32 2147483647, %v1041_v0 }
  0x3f   :  { %v434_v31 = vsel %vm269_vm0, %v400_v28, 0.0  ;;  %v394_v41 = vand.u32 2147483647, %v795_v26  ;;  %v518_v30 = vand.u32 2147483647, %v1022_v38  ;;  %v1141_v16 = vand.u32 127, %v327_v4 }
  0x40   :  { %308 = vadd.xlane.f32.xlu0 %v307_v2  ;;  %v413_v11 = vsel %vm269_vm0, %v393_v40, 0.0  ;;  %v549_v33 = vsel %vm269_vm0, %v517_v35, 0.0  ;;  %v511_v51 = vand.u32 2147483647, %v882_v24  ;;  %v519_v39 = vand.u32 2147483647, %v1006_v13 }
  0x41   :  { %v416_v45 = vsel %vm269_vm0, %v394_v41, 0.0  ;;  %v552_v9 = vsel %vm269_vm0, %v518_v30, 0.0  ;;  %v512_v26 = vand.u32 2147483647, %v806_v32  ;;  %v401_v54 = vand.u32 2147483647, %v1004_v12 }
  0x42   :  { %408 = vadd.xlane.f32.xlu2 %v407_v3  ;;  %v531_v0 = vsel %vm269_vm0, %v511_v51, 0.0  ;;  %v555_v53 = vsel %vm269_vm0, %v519_v39, 0.0  ;;  %v513_v29 = vand.u32 2147483647, %v856_v5  ;;  %v402_v13 = vand.u32 2147483647, %v1069_v42 }
  0x43   :  { %v534_v38 = vsel %vm269_vm0, %v512_v26, 0.0  ;;  %v437_v24 = vsel %vm269_vm0, %v401_v54, 0.0  ;;  %v395_v57 = vand.u32 2147483647, %v835_v50  ;;  %v403_v58 = vand.u32 2147483647, %v1058_v19 }
  0x44   :  { %405 = vadd.xlane.f32.xlu1 %v404_v23  ;;  %v537_v56 = vsel %vm269_vm0, %v513_v29, 0.0  ;;  %v440_v32 = vsel %vm269_vm0, %v402_v13, 0.0  ;;  %v396_v5 = vand.u32 2147483647, %v975_v46  ;;  %v520_v60 = vand.u32 2147483647, %v1073_v52 }
  0x45   :  { %v419_v12 = vsel %vm269_vm0, %v395_v57, 0.0  ;;  %v443_v10 = vsel %vm288_vm1, %v403_v58, 0.0  ;;  %v521_v50 = vand.u32 2147483647, %v1064_v34  ;;  %v514_v1 = vand.u32 2147483647, %v987_v59 }
  0x46   :  { %v422_v42 = vsel %vm288_vm1, %v396_v5, 0.0  ;;  %v558_v63 = vsel %vm269_vm0, %v520_v60, 0.0  ;;  %v1148_v8 = vadd.s32 4294967280, %v1141_v16  ;;  %vm332_vm3 = vcmask 130112  }
  0x47   :  { %v561_v19 = vsel %vm288_vm1, %v521_v50, 0.0  ;;  %v540_v2 = vsel %vm288_vm1, %v514_v1, 0.0  ;;  %v1152_v49 = vadd.s32 4294967272, %v1141_v16  ;;  %vm336_vm4 = vcmask 195712  }
  0x48   :  { %379 = vadd.xlane.f32.xlu0 %v378_v43  ;;  %vm340_vm5 = vcmask 261312   ;;  %v1164_v28 = vadd.s32 4294967256, %v1141_v16  ;;  %vm344_vm6 = vcmask 326912   ;;  %vm348_vm7 = vcmask 392512  }
  0x49   :  { %vm352_vm8 = vcmask 458112   ;;  %vm367_vm9 = vcmask 1041409   ;;  %vm370_vm10 = vcmask 402432   ;;  %vm388_vm11 = vcmask 1024  }
  0x4a   :  { %523 = vadd.xlane.f32.xlu2 %v522_v36  ;;  %v1144_v36 = vadd.s32 4294967288, %v1141_v16 }
  0x4c   :  { %429 = vadd.xlane.f32.xlu1 %v428_v47 }
  0x50   :  { %426 = vadd.xlane.f32.xlu0 %v425_v55 }
  0x52   :  { %547 = vadd.xlane.f32.xlu2 %v546_v15 }
  0x54   :  { %544 = vadd.xlane.f32.xlu1 %v543_v7 }
  0x58   :  { %526 = vadd.xlane.f32.xlu0 %v525_v27 }
  0x5a   :  { %529 = vadd.xlane.f32.xlu2 %v528_v21 }
  0x5c   :  { %432 = vadd.xlane.f32.xlu1 %v431_v44  ;;  %v1160_v44 = vadd.s32 4294967264, %v1141_v16 }
  0x60   :  { %411 = vadd.xlane.f32.xlu0 %v410_v48 }
  0x62   :  { %435 = vadd.xlane.f32.xlu2 %v434_v31 }
  0x64   :  { %414 = vadd.xlane.f32.xlu1 %v413_v11  ;;  %v1170_v11 = vadd.s32 4294967248, %v1141_v16 }
  0x68   :  { %550 = vadd.xlane.f32.xlu0 %v549_v33 }
  0x6a   :  { %417 = vadd.xlane.f32.xlu2 %v416_v45 }
  0x6c   :  { %553 = vadd.xlane.f32.xlu1 %v552_v9 }
  0x70   :  { %532 = vadd.xlane.f32.xlu0 %v531_v0 }
  0x72   :  { %556 = vadd.xlane.f32.xlu2 %v555_v53 }
  0x74   :  { %535 = vadd.xlane.f32.xlu1 %v534_v38 }
  0x78   :  { %438 = vadd.xlane.f32.xlu0 %v437_v24 }
  0x7a   :  { %538 = vadd.xlane.f32.xlu2 %v537_v56 }
  0x7c   :  { %441 = vadd.xlane.f32.xlu1 %v440_v32 }
  0x80   :  { %420 = vadd.xlane.f32.xlu0 %v419_v12 }
  0x82   :  { %444 = vadd.xlane.f32.xlu2 %v443_v10 }
  0x84   :  { %423 = vadd.xlane.f32.xlu1 %v422_v42 }
  0x88   :  { %559 = vadd.xlane.f32.xlu0 %v558_v63 }
  0x89   :  { %v284_v62 = vpop.xlane.xlu2 %283 }
  0x8a   :  { %v278_v46 = vpop.xlane.xlu1 %277  ;;  %v343_v30 = vperm.slane %v284_v62, %v1160_v44 }
  0x8b   :  { %v335_v20 = vperm.slane %v278_v46, %v1148_v8 }
  0x8c   :  { %562 = vadd.xlane.f32.xlu1 %v561_v19  ;;  %v272_v22 = vpop.xlane.xlu0 %271 }
  0x8d   :  { %v329_v55 = vperm.slane %v272_v22, %v1141_v16 }
  0x90   :  { %541 = vadd.xlane.f32.xlu0 %v540_v2 }
  0x91   :  { %v287_v3 = vpop.xlane.xlu2 %286 }
  0x92   :  { %v347_v9 = vperm.slane %v287_v3, %v1164_v28 }
  0x93   :  { %v281_v23 = vpop.xlane.xlu1 %280 }
  0x94   :  { %v339_v48 = vperm.slane %v281_v23, %v1152_v49 }
  0x96   :  { %v275_v52 = vpop.xlane.xlu0 %274 }
  0x97   :  { %v331_v47 = vperm.slane %v275_v52, %v1144_v36 }
  0x99   :  { %v333_v15 = vsel %vm332_vm3, %v331_v47, %v329_v55 }
  0x9a   :  { %v337_v25 = vsel %vm336_vm4, %v335_v20, %v333_v15 }
  0x9b   :  { %v341_v33 = vsel %vm340_vm5, %v339_v48, %v337_v25 }
  0x9c   :  { %v345_v39 = vsel %vm344_vm6, %v343_v30, %v341_v33 }
  0x9d   :  { %v297_v6 = vpop.xlane.xlu2 %296  ;;  %v349_v24 = vsel %vm348_vm7, %v347_v9, %v345_v39 }
  0x9e   :  { %v355_v7 = vperm.slane %v297_v6, %v1144_v36 }
  0x9f   :  { %v294_v43 = vpop.xlane.xlu1 %293 }
  0xa0   :  { %v354_v37 = vperm.slane %v294_v43, %v1141_v16 }
  0xa1   :  { %v291_v34 = vpop.xlane.xlu0 %290 }
  0xa2   :  { %v356_v40 = vsel %vm332_vm3, %v355_v7, %v354_v37  ;;  %v351_v0 = vperm.slane %v291_v34, %v1170_v11 }
  0xa4   :  { %v353_v32 = vsel %vm352_vm8, %v351_v0, %v349_v24 }
  0xa5   :  { %v306_v59 = vpop.xlane.xlu2 %305 }
  0xa6   :  { %v361_v45 = vperm.slane %v306_v59, %v1160_v44 }
  0xa7   :  { %v303_v14 = vpop.xlane.xlu1 %302 }
  0xa8   :  { %v359_v31 = vperm.slane %v303_v14, %v1152_v49 }
  0xab   :  { %v300_v27 = vpop.xlane.xlu0 %299 }
  0xac   :  { %v357_v18 = vperm.slane %v300_v27, %v1148_v8  ;;  %v493_v27 = vand.u32 2147483647, %v926_v61 }
  0xad   :  { %v377_v21 = vpop.xlane.xlu2 %376 }
  0xae   :  { %v358_v35 = vsel %vm336_vm4, %v357_v18, %v356_v40  ;;  %v497_v18 = vsel %vm374_vm2, %v493_v27, 0.0 }
  0xaf   :  { %v312_v41 = vpop.xlane.xlu1 %311  ;;  %v360_v51 = vsel %vm340_vm5, %v359_v31, %v358_v35  ;;  %498 = vadd.xlane.f32.xlu2 %v497_v18 }
  0xb0   :  { %v365_v26 = vperm.slane %v312_v41, %v1170_v11  ;;  %v362_v29 = vsel %vm344_vm6, %v361_v45, %v360_v51 }
  0xb3   :  { %v309_v53 = vpop.xlane.xlu0 %308 }
  0xb4   :  { %v363_v38 = vperm.slane %v309_v53, %v1164_v28 }
  0xb5   :  { %v409_v54 = vpop.xlane.xlu2 %408 }
  0xb6   :  { %v364_v13 = vsel %vm348_vm7, %v363_v38, %v362_v29  ;;  %v461_v56 = vperm.slane %v409_v54, %v1144_v36 }
  0xb7   :  { %v406_v57 = vpop.xlane.xlu1 %405  ;;  %v366_v58 = vsel %vm352_vm8, %v365_v26, %v364_v13 }
  0xb8   :  { %v460_v12 = vperm.slane %v406_v57, %v1141_v16  ;;  %v368_v5 = vsel %vm367_vm9, %v366_v58, %v353_v32 }
  0xb9   :  { %371 = vst.msk [vmem:[#allocation2] sm:$0x3] %vm370_vm10, %v368_v5 }
  0xba   :  { %v462_v10 = vsel %vm332_vm3, %v461_v56, %v460_v12 }
  0xbb   :  { %v380_v42 = vpop.xlane.xlu0 %379 }
  0xbc   :  { %v385_v60 = vrot.slane %v380_v42, 7 }
  0xbd   :  { %v524_v63 = vpop.xlane.xlu2 %523 }
  0xbe   :  { %v386_v50 = vsel %vm367_vm9, %v385_v60, %v377_v21  ;;  %v578_v4 = vperm.slane %v524_v63, %v1141_v16  ;;  %v492_v21 = vand.u32 2147483647, %v781_v17 }
  0xbf   :  { %v430_v19 = vpop.xlane.xlu1 %429  ;;  %389 = vst.msk [vmem:[%s1288_s9] sm:$0x3] %vm388_vm11, %v386_v50  ;;  %s673_s9 = smov [#allocation2]  }
  0xc0   :  { %v474_v1 = vperm.slane %v430_v19, %v1144_v36  ;;  %s615_s4 = sshll.u32 %s673_s9, 4  ;;  %s616_s4 = int_to_ptr.vmem [resolvable:$true] %s615_s4 }
  0xc1   :  { %620 = dma.vmem_to_hbm [thread:$0]  %s616_s4, 32, %s618_s28, [#allocation3]  }
  0xc3   :  { %v427_v62 = vpop.xlane.xlu0 %426 }
  0xc4   :  { %v473_v46 = vperm.slane %v427_v62, %v1141_v16 }
  0xc5   :  { %v548_v2 = vpop.xlane.xlu2 %547 }
  0xc6   :  { %v475_v22 = vsel %vm332_vm3, %v474_v1, %v473_v46  ;;  %v592_v3 = vperm.slane %v548_v2, %v1144_v36 }
  0xc7   :  { %v545_v23 = vpop.xlane.xlu1 %544 }
  0xc8   :  { %v591_v52 = vperm.slane %v545_v23, %v1141_v16 }
  0xca   :  { %v1204_v6 = vsel %vm332_vm3, %v592_v3, %v591_v52 }
  0xcb   :  { %v527_v43 = vpop.xlane.xlu0 %526 }
  0xcc   :  { %v579_v34 = vperm.slane %v527_v43, %v1144_v36  ;;  %v494_v36 = vsel %vm374_vm2, %v492_v21, 0.0 }
  0xcd   :  { %v1207_v59 = vpop.xlane.xlu2 %529  ;;  %495 = vadd.xlane.f32.xlu0 %v494_v36 }
  0xce   :  { %v1210_v47 = vsel %vm332_vm3, %v579_v34, %v578_v4  ;;  %v581_v1 = vperm.slane %v1207_v59, %v1148_v8 }
  0xcf   :  { %v433_v14 = vpop.xlane.xlu1 %432 }
  0xd0   :  { %v476_v33 = vperm.slane %v433_v14, %v1148_v8 }
  0xd2   :  { %v477_v39 = vsel %vm336_vm4, %v476_v33, %v475_v22 }
  0xd3   :  { %v412_v55 = vpop.xlane.xlu0 %411 }
  0xd4   :  { %v463_v61 = vperm.slane %v412_v55, %v1148_v8 }
  0xd5   :  { %v436_v15 = vpop.xlane.xlu2 %435 }
  0xd6   :  { %v478_v30 = vperm.slane %v436_v15, %v1152_v49  ;;  %v464_v29 = vsel %vm336_vm4, %v463_v61, %v462_v10 }
  0xd7   :  { %v415_v7 = vpop.xlane.xlu1 %414 }
  0xd8   :  { %v465_v17 = vperm.slane %v415_v7, %v1152_v49  ;;  %v479_v53 = vsel %vm340_vm5, %v478_v30, %v477_v39 }
  0xda   :  { %v466_v13 = vsel %vm340_vm5, %v465_v17, %v464_v29 }
  0xdb   :  { %v551_v37 = vpop.xlane.xlu0 %550 }
  0xdc   :  { %v594_v63 = vperm.slane %v551_v37, %v1148_v8  ;;  %v582_v8 = vsel %vm336_vm4, %v581_v1, %v1210_v47 }
  0xdd   :  { %v418_v20 = vpop.xlane.xlu2 %417 }
  0xde   :  { %v467_v0 = vperm.slane %v418_v20, %v1160_v44  ;;  %v595_v3 = vsel %vm336_vm4, %v594_v63, %v1204_v6 }
  0xdf   :  { %v554_v16 = vpop.xlane.xlu1 %553 }
  0xe0   :  { %v468_v57 = vsel %vm344_vm6, %v467_v0, %v466_v13  ;;  %v596_v19 = vperm.slane %v554_v16, %v1152_v49 }
  0xe2   :  { %v597_v4 = vsel %vm340_vm5, %v596_v19, %v595_v3 }
  0xe3   :  { %v533_v25 = vpop.xlane.xlu0 %532 }
  0xe4   :  { %v583_v46 = vperm.slane %v533_v25, %v1152_v49 }
  0xe5   :  { %v557_v48 = vpop.xlane.xlu2 %556 }
  0xe6   :  { %v598_v62 = vperm.slane %v557_v48, %v1160_v44  ;;  %v584_v49 = vsel %vm340_vm5, %v583_v46, %v582_v8 }
  0xe7   :  { %v536_v40 = vpop.xlane.xlu1 %535 }
  0xe8   :  { %v585_v23 = vperm.slane %v536_v40, %v1160_v44  ;;  %v599_v34 = vsel %vm344_vm6, %v598_v62, %v597_v4 }
  0xea   :  { %v586_v6 = vsel %vm344_vm6, %v585_v23, %v584_v49 }
  0xeb   :  { %v439_v31 = vpop.xlane.xlu0 %438 }
  0xec   :  { %v480_v45 = vperm.slane %v439_v31, %v1160_v44 }
  0xed   :  { %v539_v35 = vpop.xlane.xlu2 %538 }
  0xee   :  { %v481_v24 = vsel %vm344_vm6, %v480_v45, %v479_v53  ;;  %v587_v43 = vperm.slane %v539_v35, %v1164_v28 }
  0xef   :  { %v442_v41 = vpop.xlane.xlu1 %441 }
  0xf0   :  { %v482_v9 = vperm.slane %v442_v41, %v1164_v28  ;;  %v588_v15 = vsel %vm348_vm7, %v587_v43, %v586_v6 }
  0xf2   :  { %v483_v56 = vsel %vm348_vm7, %v482_v9, %v481_v24 }
  0xf3   :  { %v421_v51 = vpop.xlane.xlu0 %420 }
  0xf4   :  { %v469_v38 = vperm.slane %v421_v51, %v1164_v28 }
  0xf5   :  { %v445_v26 = vpop.xlane.xlu2 %444 }
  0xf6   :  { %v484_v54 = vperm.slane %v445_v26, %v1170_v11  ;;  %v470_v5 = vsel %vm348_vm7, %v469_v38, %v468_v57 }
  0xf7   :  { %v424_v32 = vpop.xlane.xlu1 %423 }
  0xf8   :  { %v471_v58 = vperm.slane %v424_v32, %v1170_v11  ;;  %v485_v12 = vsel %vm352_vm8, %v484_v54, %v483_v56 }
  0xfa   :  { %v472_v42 = vsel %vm352_vm8, %v471_v58, %v470_v5 }
  0xfb   :  { %v560_v60 = vpop.xlane.xlu0 %559  ;;  %v486_v10 = vsel %vm367_vm9, %v485_v12, %v472_v42 }
  0xfc   :  { %v488_v50 = vsel %vm370_vm10, %v486_v10, 0.0  ;;  %v600_v2 = vperm.slane %v560_v60, %v1164_v28 }
  0xfd   :  { %489 = vadd.xlane.f32.xlu1 %v488_v50 }
  0xfe   :  { %v601_v59 = vsel %vm348_vm7, %v600_v2, %v599_v34 }
  0xff   :  { %v563_v22 = vpop.xlane.xlu1 %562 }
 0x100   :  { %v602_v52 = vperm.slane %v563_v22, %v1170_v11 }
 0x102   :  { %v603_v55 = vsel %vm352_vm8, %v602_v52, %v601_v59 }
 0x103   :  { %v542_v14 = vpop.xlane.xlu0 %541 }
 0x104   :  { %v589_v44 = vperm.slane %v542_v14, %v1170_v11 }
 0x106   :  { %v590_v28 = vsel %vm352_vm8, %v589_v44, %v588_v15 }
 0x107   :  { %v604_v7 = vsel %vm367_vm9, %v603_v55, %v590_v28 }
 0x108   :  { %v606_v47 = vsel %vm370_vm10, %v604_v7, 0.0 }
 0x109   :  { %607 = vadd.xlane.f32.xlu2 %v606_v47 }
 0x122   :  { %v499_v37 = vpop.xlane.xlu2 %498 }
 0x123   :  { %v504_v20 = vrot.slane %v499_v37, 7 }
 0x140   :  { %v496_v27 = vpop.xlane.xlu0 %495 }
 0x141   :  { %v505_v16 = vsel %vm367_vm9, %v504_v20, %v496_v27 }
 0x142   :  { %507 = vst.msk [vmem:[%s1290_s11] sm:$0x3] %vm388_vm11, %v505_v16 }
 0x170   :  { %v490_v11 = vpop.xlane.xlu1 %489 }
 0x171   :  { %491 = vst.msk [vmem:[%s1289_s10] sm:$0x3] %vm388_vm11, %v490_v11 }
 0x17c   :  { %v608_v18 = vpop.xlane.xlu2 %607 }
 0x17d   :  { %609 = vst.msk [vmem:[%s1291_s12] sm:$0x3] %vm388_vm11, %v608_v18 }
 0x17e   :  { %671 = dma.done.wait [#allocation3], 32  }
 0x17f   :  { %672 = vsyncadd [#allocation3], 4294967264 }
 0x180   :  { %641 = vsyncpa [#allocation3], 1 }

</bundles_post_ra>
